<compile_context>
chip_gen: v7x
topology: tpu7x:2x2x1
jax: 0.10.0
libtpu: 0.0.40
codegen_flags: <defaults>
</compile_context>

<pallas_src>
import functools

import numpy as np
import jax
import jax.numpy as jnp
from jax import lax
from jax.experimental import pallas as pl
from jax.experimental.pallas import tpu as pltpu

LANE = 128
MASK_NEG = -1e30          # f32-safe mask sentinel (scores/softmax stay in f32)


def round_up(x, m):
    return ((x + m - 1) // m) * m


def pick_tile(total, want):
    """Largest multiple of LANE that divides `total` and is <= `want`."""
    t = min(want, total)
    while total % t != 0:
        t -= LANE
    return t


def pad2(x, rows, cols):
    """Zero-pad a 2-D array up to (rows, cols)."""
    return jnp.zeros((rows, cols), x.dtype).at[:x.shape[0], :x.shape[1]].set(x)


# ----------------------------------------------------------------------------
# Per-layer projection kernel:  H = feats @ W + bW  (+ fused graph readout)
# ----------------------------------------------------------------------------
def project_kernel(*refs, with_readout):
    if with_readout:
        (feats_ref, w_ref, bw_ref, wout_ref, bout_ref, seg_ref,
         h_ref, hb_ref, g_ref) = refs
    else:
        feats_ref, w_ref, bw_ref, h_ref, hb_ref = refs

    x = feats_ref[...]                                              # (tm, FP) f32
    # bf16 MXU operands, f32 accumulation (W shipped as bf16 to halve its DMA).
    h = jnp.dot(x.astype(w_ref.dtype), w_ref[...],
                preferred_element_type=jnp.float32) + bw_ref[...]
    h_ref[...] = h                                                  # f32 (query/output path)
    hb_ref[...] = h.astype(jnp.bfloat16)                            # bf16 (streamed value path)

    if with_readout:
        # Fused graph readout (uses the ORIGINAL feats, as GAT.forward does):
        # per-row-tile partial of  seg @ (feats @ w_out + b_out), kept in f32.
        y = jnp.dot(x, wout_ref[...], preferred_element_type=jnp.float32) + bout_ref[0, 0]
        g_ref[0] = jnp.dot(seg_ref[...], y, preferred_element_type=jnp.float32)


def gat_project(feats_p, W_b16, bW_p, *, tm, readout=None):
    """H = feats_p @ W + bW, tiled over row tiles.  Returns (H_f32, H_bf16[, gpart])."""
    NP, FP = feats_p.shape
    HP = W_b16.shape[1]
    n_i = NP // tm
    with_readout = readout is not None

    in_specs = [
        pl.BlockSpec((tm, FP), lambda i: (i, 0)),                    # feats row tile (f32)
        pl.BlockSpec((FP, HP), lambda i: (0, 0)),                    # W (bf16)
        pl.BlockSpec((1, HP), lambda i: (0, 0)),                     # bW (f32)
    ]
    inputs = [feats_p, W_b16, bW_p]
    out_shapes = [jax.ShapeDtypeStruct((NP, HP), jnp.float32),
                  jax.ShapeDtypeStruct((NP, HP), jnp.bfloat16)]
    out_specs = [pl.BlockSpec((tm, HP), lambda i: (i, 0)),
                 pl.BlockSpec((tm, HP), lambda i: (i, 0))]

    if with_readout:
        w_out_col, b_out, seg_p = readout
        g_pad = seg_p.shape[0]
        in_specs += [
            pl.BlockSpec((FP, 1), lambda i: (0, 0)),                 # w_out column (f32)
            pl.BlockSpec(memory_space=pltpu.MemorySpace.SMEM),       # b_out (1,1)
            pl.BlockSpec((g_pad, tm), lambda i: (0, i)),             # seg-mean columns
        ]
        inputs += [w_out_col, b_out, seg_p]
        out_shapes.append(jax.ShapeDtypeStruct((n_i, g_pad, 1), jnp.float32))
        out_specs.append(pl.BlockSpec((1, g_pad, 1), lambda i: (i, 0, 0)))

    kern = functools.partial(project_kernel, with_readout=with_readout)
    return pl.pallas_call(
        kern,
        grid=(n_i,),
        in_specs=in_specs,
        out_specs=tuple(out_specs),
        out_shape=tuple(out_shapes),
        compiler_params=pltpu.CompilerParams(dimension_semantics=("parallel",)),
    )(*inputs)


# ----------------------------------------------------------------------------
# Fused attention sweep (+ ELU from GAT.forward) over adjacency column tiles
# ----------------------------------------------------------------------------
def gat_attn_kernel(flags_ref, battn_ref, hq_ref, hk_ref, adj_ref, asrc_ref, adst_ref,
                    out_ref, s_scr, m_scr, l_scr, acc_scr,
                    *, num_heads, mean_heads, store_output):
    i = pl.program_id(0)
    j = pl.program_id(1)
    nj = pl.num_programs(1)

    @pl.when(j == 0)
    def _init():
        # Attention "source" projection depends only on the row tile -> hoisted
        # out of the column sweep into a small VMEM scratch.
        s_scr[...] = lax.dot_general(
            hq_ref[...], asrc_ref[...],
            dimension_numbers=(((1,), (1,)), ((), ())),
            preferred_element_type=jnp.float32)                       # (tm, heads)
        m_scr[...] = jnp.full(m_scr.shape, MASK_NEG, dtype=m_scr.dtype)
        l_scr[...] = jnp.zeros(l_scr.shape, l_scr.dtype)
        acc_scr[...] = jnp.zeros(acc_scr.shape, acc_scr.dtype)

    # Block-sparse skip: an (i, j) tile with no edges contributes nothing.
    @pl.when(flags_ref[i, j] > 0)
    def _step():
        hk = hk_ref[...]                                              # (tn, HP) bf16
        mask = adj_ref[...] > 0                                       # int8 -> bool directly
        t_all = lax.dot_general(                                      # (heads, tn)
            adst_ref[...].astype(jnp.bfloat16), hk,
            dimension_numbers=(((1,), (1,)), ((), ())),
            preferred_element_type=jnp.float32)
        s_all = s_scr[...]
        for k in range(num_heads):
            # e[i, j] = LeakyReLU(a_src . h_i + a_dst . h_j + b)     (f32 throughout)
            e = s_all[:, k:k + 1] + t_all[k:k + 1, :] + battn_ref[k, 0]
            e = jnp.where(e > 0.0, e, 0.01 * e)                       # LeakyReLU(0.01)
            e = jnp.where(mask, e, MASK_NEG)
            # online (streaming) masked softmax over neighbour columns
            m_prev = m_scr[k]
            m_new = jnp.maximum(m_prev, jnp.max(e, axis=1, keepdims=True))
            alpha = jnp.exp(m_prev - m_new)
            p = jnp.where(mask, jnp.exp(e - m_new), 0.0)              # guard: keep this where
            l_scr[k] = alpha * l_scr[k] + jnp.sum(p, axis=1, keepdims=True)
            acc_scr[k] = alpha * acc_scr[k] + jnp.dot(
                p.astype(jnp.bfloat16), hk, preferred_element_type=jnp.float32)
            m_scr[k] = m_new

    @pl.when(j == nj - 1)
    def _finalize():
        if store_output:
            h_q = hq_ref[...]
            head_outs = []
            for k in range(num_heads):
                denom = l_scr[k]
                has_nb = denom > 0.0
                inv = pl.reciprocal(jnp.where(has_nb, denom, 1.0), approx=True)   # EUP
                agg = jnp.where(has_nb, acc_scr[k] * inv, 0.0)
                # TODO(synk): the PyTorch loop updates feat_heads in place in sorted
                # node order (later nodes may aggregate already-updated neighbours);
                # we use the standard parallel GAT aggregation.  GAT.forward discards
                # this intermediate, so the module's output is unaffected.
                head_outs.append(h_q + agg)
            if mean_heads:
                out = head_outs[0]
                for ho in head_outs[1:]:
                    out = out + ho
                out = out * (1.0 / float(num_heads))
            else:
                # TODO(synk): heads could be packed into one round_up(heads*H,128)-wide
                # slab to cut writeback when H << 128; kept per-head 128-padded slabs.
                out = head_outs[0] if num_heads == 1 else jnp.concatenate(head_outs, axis=1)
            # GAT.forward: elu(dropout(.)); dropout is identity in eval mode.
            out_ref[...] = jnp.where(out > 0.0, out,
                                     jnp.exp(jnp.minimum(out, 0.0)) - 1.0)
        else:
            # GAT.forward discards every layer's h -> tiny placeholder only.
            out_ref[...] = jnp.zeros(out_ref.shape, out_ref.dtype)


def gat_attention(h_f32, h_b16, adj_i8, tile_flags, a_src_p, a_dst_p, b_attn, *,
                  mean_heads, tm, tn, store_output):
    NP, HP = h_f32.shape
    heads = a_src_p.shape[0]
    assert NP % tm == 0 and NP % tn == 0 and HP % LANE == 0
    n_i, n_j = NP // tm, NP // tn
    assert tile_flags.shape == (n_i, n_j)
    out_p = HP if mean_heads else heads * HP

    in_specs = [
        pl.BlockSpec(memory_space=pltpu.MemorySpace.SMEM),            # tile flags (n_i, n_j)
        pl.BlockSpec(memory_space=pltpu.MemorySpace.SMEM),            # b_attn (heads, 1)
        pl.BlockSpec((tm, HP), lambda i, j: (i, 0)),                  # H row (query) tile, f32
        pl.BlockSpec((tn, HP), lambda i, j: (j, 0)),                  # H col (neighbour) tile, bf16
        pl.BlockSpec((tm, tn), lambda i, j: (i, j)),                  # adjacency tile, int8
        pl.BlockSpec((heads, HP), lambda i, j: (0, 0)),               # a_src (f32)
        pl.BlockSpec((heads, HP), lambda i, j: (0, 0)),               # a_dst (f32, cast in-kernel)
    ]
    inputs = [tile_flags, b_attn, h_f32, h_b16, adj_i8, a_src_p, a_dst_p]

    if store_output:
        out_shape = jax.ShapeDtypeStruct((NP, out_p), jnp.float32)
        out_specs = pl.BlockSpec((tm, out_p), lambda i, j: (i, 0))
    else:
        out_shape = jax.ShapeDtypeStruct((n_i, 8, LANE), jnp.float32)
        out_specs = pl.BlockSpec((1, 8, LANE), lambda i, j: (i, 0, 0))

    kern = functools.partial(gat_attn_kernel, num_heads=heads, mean_heads=mean_heads,
                             store_output=store_output)

    return pl.pallas_call(
        kern,
        grid=(n_i, n_j),
        in_specs=in_specs,
        out_specs=out_specs,
        out_shape=out_shape,
        scratch_shapes=[
            pltpu.VMEM((tm, heads), jnp.float32),       # hoisted s = H_q @ a_src^T
            pltpu.VMEM((heads, tm, 1), jnp.float32),    # running max  m
            pltpu.VMEM((heads, tm, 1), jnp.float32),    # running sum  l
            pltpu.VMEM((heads, tm, HP), jnp.float32),   # running acc  p @ H
        ],
        compiler_params=pltpu.CompilerParams(
            dimension_semantics=("parallel", "arbitrary"),
            vmem_limit_bytes=32 * 1024 * 1024),
    )(*inputs)


# ----------------------------------------------------------------------------
# pure-JAX reference (for correctness checks)
# ----------------------------------------------------------------------------
def gat_layer_ref(feats, adj, W, bW, a_src, a_dst, b_attn, mean_heads):
    h = feats @ W + bW
    mask = adj > 0.0
    outs = []
    for k in range(a_src.shape[0]):
        s = jnp.sum(h * a_src[k][None, :], axis=1, keepdims=True)
        t = jnp.sum(h * a_dst[k][None, :], axis=1, keepdims=True)
        e = s + t.T + b_attn[k]
        e = jnp.where(e > 0.0, e, 0.01 * e)
        e_m = jnp.where(mask, e, MASK_NEG)
        p = jnp.where(mask, jnp.exp(e_m - e_m.max(axis=1, keepdims=True)), 0.0)
        den = p.sum(axis=1, keepdims=True)
        has = den > 0.0
        agg = jnp.where(has, (p @ h) / jnp.where(has, den, 1.0), 0.0)
        outs.append(h + agg)
    out = sum(outs) / len(outs) if mean_heads else jnp.concatenate(outs, axis=1)
    return jnp.where(out > 0.0, out, jnp.exp(jnp.minimum(out, 0.0)) - 1.0)


def linear_params(key, fan_in, fan_out):
    k1, k2 = jax.random.split(key)
    bound = 1.0 / np.sqrt(fan_in)
    w = jax.random.uniform(k1, (fan_in, fan_out), jnp.float32, -bound, bound)
    b = jax.random.uniform(k2, (1, fan_out), jnp.float32, -bound, bound)
    return w, b


if __name__ == "__main__":
    # GAT(feats_in_size=16, num_attention_heads=[1], num_hidden_nodes=[16])
    # (sizes for which the reference module is runnable, since `f` is never
    #  updated inside GAT.forward).
    N, F = 160, 16
    num_attention_heads = [1]
    num_hidden_nodes = [16]
    lens = [40, 60, 60]
    TM, TN = 128, 512              # TN shrinks to the largest divisor of padded N

    key = jax.random.PRNGKey(0)
    k_feats, k_adj, k_params = jax.random.split(key, 3)
    feats = jax.random.normal(k_feats, (N, F), jnp.float32)
    adj = (jax.random.uniform(k_adj, (N, N)) < 0.25).astype(jnp.float32)

    # ---- padded / dtype-converted device inputs (lane-dense, int8 adjacency)
    NP = round_up(N, TM)
    TN_EFF = pick_tile(NP, TN)
    FP = round_up(F, LANE)
    n_i, n_j = NP // TM, NP // TN_EFF
    feats_p = pad2(feats, NP, FP)                                     # f32 (also feeds readout)
    adj_i8 = jnp.zeros((NP, NP), jnp.int8).at[:N, :N].set(adj.astype(jnp.int8))
    # per-(row-tile, col-tile) "any edge" flags -> block-sparse compute skip
    tile_flags = jnp.any(adj_i8.reshape(n_i, TM, n_j, TN_EFF) > 0,
                         axis=(1, 3)).astype(jnp.int32)

    # ---- build the stack of GraphAttentionLayers exactly as GAT.__init__ does
    feats_in_sizes = [F]
    for nh, nu in zip(num_attention_heads[:-1], num_hidden_nodes[:-1]):
        feats_in_sizes.append(int(nh * nu))
    layer_cfgs = list(zip(feats_in_sizes, num_attention_heads, num_hidden_nodes,
                          [False] * len(num_hidden_nodes)))
    layer_cfgs.append((num_hidden_nodes[-1] * num_attention_heads[-1], 1,
                       num_hidden_nodes[-1], True))                   # final mean-head layer

    layer_params = []
    pkey = k_params
    for fs, nh, nu, mean_heads in layer_cfgs:
        pkey, kw, ka = jax.random.split(pkey, 3)
        W, bW = linear_params(kw, fs, nu)                             # W(feats)
        a, b_attn = linear_params(ka, 2 * nu, nh)                     # attn heads stacked
        a = a.T                                                       # (nh, 2*nu)
        a_src, a_dst = a[:, :nu], a[:, nu:]
        b_attn = b_attn.T                                             # (nh, 1)
        layer_params.append((W, bW, a_src, a_dst, b_attn, mean_heads))

    pkey, ko = jax.random.split(pkey)
    w_out, b_out = linear_params(ko, num_hidden_nodes[-1], 1)         # self.out
    w_out_col = pad2(w_out, FP, 1)                                    # (FP, 1) f32
    b_out_s = b_out                                                   # (1, 1) -> SMEM

    # ---- readout segment-mean matrix: graphs[c-1] = mean(y[cumsum[c-1]:cumsum[c]])
    cumsums = np.cumsum(lens)
    G = len(cumsums) - 1
    G_PAD = 8
    seg_np = np.zeros((G_PAD, NP), np.float32)
    for c in range(1, len(cumsums)):
        s, e = int(cumsums[c - 1]), int(cumsums[c])
        seg_np[c - 1, s:e] = 1.0 / float(e - s)
    seg_p = jnp.asarray(seg_np)

    # ---- run the GAT layers (outputs discarded upstream, exactly like the module);
    #      fuse the readout into the final layer's projection pallas_call.
    gpart = None
    for li, (W, bW, a_src, a_dst, b_attn, mean_heads) in enumerate(layer_params):
        H = W.shape[1]
        HP = round_up(H, LANE)
        heads = a_src.shape[0]
        Wb = pad2(W, FP, HP).astype(jnp.bfloat16)                     # bf16 MXU operand
        bWp = pad2(bW, 1, HP)
        asp, adp = pad2(a_src, heads, HP), pad2(a_dst, heads, HP)

        is_last = li == len(layer_params) - 1
        readout = (w_out_col, b_out_s, seg_p) if is_last else None

        proj = gat_project(feats_p, Wb, bWp, tm=TM, readout=readout)
        if is_last:
            h_f32, h_b16, gpart = proj
        else:
            h_f32, h_b16 = proj

        if not is_last:
            # Production path: GAT.forward discards h -> skip the big writeback + ELU.
            _ = jax.block_until_ready(
                gat_attention(h_f32, h_b16, adj_i8, tile_flags, asp, adp, b_attn,
                              mean_heads=mean_heads, tm=TM, tn=TN_EFF,
                              store_output=False))

        # Verification path (writes h so we can compare against pure JAX).
        h_out = jax.block_until_ready(
            gat_attention(h_f32, h_b16, adj_i8, tile_flags, asp, adp, b_attn,
                          mean_heads=mean_heads, tm=TM, tn=TN_EFF,
                          store_output=True))

        h_ref = gat_layer_ref(feats, adj, W, bW, a_src, a_dst, b_attn, mean_heads)
        if mean_heads:
            got = h_out[:N, :H]
        else:
            got = jnp.concatenate([h_out[:N, k * HP:k * HP + H] for k in range(heads)],
                                  axis=1)
        np.testing.assert_allclose(np.asarray(got), np.asarray(h_ref),
                                   rtol=2e-2, atol=2e-2)   # bf16 MXU + approx-reciprocal tol

    # ---- fused readout: sum the per-row-tile partials (tiny XLA reduction)
    graphs = jax.block_until_ready(jnp.sum(gpart, axis=0))[:G, 0]     # (G,)

    y_ref = np.asarray(feats) @ np.asarray(w_out) + np.asarray(b_out)  # (N, 1)
    graphs_ref = np.stack([np.mean(y_ref[cumsums[c - 1]:cumsums[c]])
                           for c in range(1, len(cumsums))])
    np.testing.assert_allclose(np.asarray(graphs), graphs_ref, rtol=1e-4, atol=1e-4)

    print("KERNEL_OK")
</pallas_src>

<mosaic_0001>
module attributes {stable_mosaic.version = 11 : i64} {
  func.func @project_kernel(%arg0: i32, %arg1: memref<128x128xf32, #tpu.memory_space<vmem>>, %arg2: memref<128x128xbf16, #tpu.memory_space<vmem>>, %arg3: memref<1x128xf32, #tpu.memory_space<vmem>>, %arg4: memref<128x128xf32, #tpu.memory_space<vmem>>, %arg5: memref<128x128xbf16, #tpu.memory_space<vmem>>) attributes {dimension_semantics = [#tpu.dimension_semantics<parallel>], iteration_bounds = array<i64: 2>, scalar_prefetch = 0 : i64, scratch_operands = 0 : i64, tpu.core_type = #tpu.core_type<tc>, window_params = [{transform_indices = @transform_0, window_bounds = array<i64: 128, 128>}, {pipeline_mode = #tpu.pipeline_mode<synchronous>, transform_indices = @transform_1, window_bounds = array<i64: 128, 128>}, {pipeline_mode = #tpu.pipeline_mode<synchronous>, transform_indices = @transform_2, window_bounds = array<i64: 1, 128>}, {transform_indices = @transform_3, window_bounds = array<i64: 128, 128>}, {transform_indices = @transform_4, window_bounds = array<i64: 128, 128>}]} {
    %c0 = arith.constant 0 : index
    %c0_0 = arith.constant 0 : index
    %0 = vector.load %arg1[%c0, %c0_0] : memref<128x128xf32, #tpu.memory_space<vmem>>, vector<128x128xf32>
    %1 = arith.truncf %0 : vector<128x128xf32> to vector<128x128xbf16>
    %c0_1 = arith.constant 0 : index
    %c0_2 = arith.constant 0 : index
    %2 = vector.load %arg2[%c0_1, %c0_2] : memref<128x128xbf16, #tpu.memory_space<vmem>>, vector<128x128xbf16>
    %cst = arith.constant dense<0.000000e+00> : vector<128x128xf32>
    %3 = tpu.matmul %1, %2, %cst {dimension_numbers = #tpu.dot_dimension_numbers<[1], [0], [0], [1], [0, 0, 1, 1], [], []>} : vector<128x128xbf16>, vector<128x128xbf16>, vector<128x128xf32> -> vector<128x128xf32>
    %c0_3 = arith.constant 0 : index
    %c0_4 = arith.constant 0 : index
    %4 = vector.load %arg3[%c0_3, %c0_4] : memref<1x128xf32, #tpu.memory_space<vmem>>, vector<1x128xf32>
    %5 = vector.broadcast %4 : vector<1x128xf32> to vector<128x128xf32>
    %6 = arith.addf %3, %5 : vector<128x128xf32>
    %c0_5 = arith.constant 0 : index
    %c0_6 = arith.constant 0 : index
    %7 = vector.load %arg4[%c0_5, %c0_6] : memref<128x128xf32, #tpu.memory_space<vmem>>, vector<128x128xf32>
    tpu.vector_store %arg4[%c0_5, %c0_6], %6 {strides = array<i32>} : memref<128x128xf32, #tpu.memory_space<vmem>>, vector<128x128xf32>,
    %8 = arith.truncf %6 : vector<128x128xf32> to vector<128x128xbf16>
    %c0_7 = arith.constant 0 : index
    %c0_8 = arith.constant 0 : index
    %9 = vector.load %arg5[%c0_7, %c0_8] : memref<128x128xbf16, #tpu.memory_space<vmem>>, vector<128x128xbf16>
    tpu.vector_store %arg5[%c0_7, %c0_8], %8 {strides = array<i32>} : memref<128x128xbf16, #tpu.memory_space<vmem>>, vector<128x128xbf16>,
    return
  }
  func.func @transform_0(%arg0: i32) -> (i32, i32) {
    %c0_i32 = arith.constant 0 : i32
    %c0_i32_0 = arith.constant 0 : i32
    return %arg0, %c0_i32 : i32, i32
  }
  func.func @transform_1(%arg0: i32) -> (i32, i32) {
    %c0_i32 = arith.constant 0 : i32
    %c0_i32_0 = arith.constant 0 : i32
    %c0_i32_1 = arith.constant 0 : i32
    return %c0_i32, %c0_i32_0 : i32, i32
  }
  func.func @transform_2(%arg0: i32) -> (i32, i32) {
    %c0_i32 = arith.constant 0 : i32
    %c0_i32_0 = arith.constant 0 : i32
    %c0_i32_1 = arith.constant 0 : i32
    return %c0_i32, %c0_i32_0 : i32, i32
  }
  func.func @transform_3(%arg0: i32) -> (i32, i32) {
    %c0_i32 = arith.constant 0 : i32
    %c0_i32_0 = arith.constant 0 : i32
    return %arg0, %c0_i32 : i32, i32
  }
  func.func @transform_4(%arg0: i32) -> (i32, i32) {
    %c0_i32 = arith.constant 0 : i32
    %c0_i32_0 = arith.constant 0 : i32
    return %arg0, %c0_i32 : i32, i32
  }
}

</mosaic_0001>

<bundles_post_ra>
// kernel: tpu_custom_call.1
= control target key start
LH: loop header
LB: loop body
LE: loop exit
PB: predicated region body
PF: predicated region fallthrough
CT: control target
= control target key end

     0   :  { %10 = vsyncpa [#allocation3], 0  ;;  %s1425_s0 = inlined_call_operand.hbm [shape: f32[256,128], index: 0, kind: input, shape index: {}]   ;;  %s1426_s1 = inlined_call_operand.hbm [shape: bf16[128,128], index: 1, kind: input, shape index: {}]   ;;  %s1427_s2 = inlined_call_operand.vmem [shape: f32[1,128], index: 2, kind: input, shape index: {}]   ;;  %s1428_s3 = inlined_call_operand.hbm [shape: f32[256,128], index: 3, kind: output, shape index: {0}]   ;;  %s1429_s4 = inlined_call_operand.hbm [shape: bf16[256,128], index: 4, kind: output, shape index: {1}]  }
   0x1   :  { %12 = vsyncpa [#allocation3 + $0x1], 0 }
   0x2   :  { %13 = vsyncpa [#allocation6], 0 }
   0x3   :  { %14 = vsyncpa [#allocation4], 0 }
   0x4   :  { %16 = vsyncpa [#allocation4 + $0x1], 0 }
   0x5   :  { %17 = vsyncpa [#allocation9], 0 }
   0x6   :  { %19 = vsyncpa [#allocation9 + $0x1], 0  ;;  %s1136_s15 = smov 0   ;;  %s1138_s16 = smov 0  }
   0x7   :  { %s1140_s17 = smov 0   ;;  %s1142_s18 = smov 0  }
   0x8 LB: > { %s1157_s19 = sadd.s32 4294967295, %s1097_s18   ;;  %s684_s20 = sadd.s32 4294967294, %s1097_s18   ;;  %s1097_s18 = sphi %s1142_s18, %s1449_s18   ;;  %s1093_s17 = sphi %s1140_s17, %s1448_s17   ;;  %s1089_s16 = sphi %s1138_s16, %s1447_s16   ;;  %s1085_s15 = sphi %s1136_s15, %s1446_s15  }
   0x9   : > { %p45_p0 = scmp.ne.s32.totalorder %s1089_s16, %s1085_s15  ;;  %p1430_p1 = scmp.eq.s32.totalorder %s1157_s19, 0 }
   0xa   : > { %p117_p3 = scmp.eq.s32.totalorder %s684_s20, 1  ;;  %p685_p5 = scmp.ge.s32.totalorder %s1097_s18, 1 }
   0xb   : > { %p1166_p4 = por %p1430_p1, %p45_p0  ;;  %p150_p7 = scmp.lt.s32.totalorder %s1097_s18, 3 }
   0xc   : > { %p1171_p6 = por %p117_p3, %p45_p0  ;;  %s1099_s24 = smov [#allocation5]  }
   0xd   : > { %s1433_s21 = scalar_select %p1166_p4, 1, 0 }
   0xe   : > { %s1434_s22 = scalar_select %p1171_p6, 1, 0 }
   0xf   : > { %p1176_p8 = pnand %p685_p5, %p150_p7  ;;  %s162_s25 = sshll.u32 %s1099_s24, 4  ;;  %s1180_s25 = int_to_ptr.vmem [resolvable:$true] %s162_s25 }
  0x10   : > { %s1192_s27 = sadd.s32 1, %s1097_s18   ;;  %s32_s28 = sadd.s32 1, %s1093_s17 }
  0x11   : > { %s1435_s23 = scalar_select %p1176_p8, 1, 0 }
  0x12   : > { %p869_p9 = pneg %p1176_p8  ;;  %s29_s29 = ssub.s32 %s1097_s18, %s1192_s27 }
  0x13   : > { %s937_s6 = scalar_lea.hbm %s1426_s1, 1024 }
  0x14   : > { %p1187_p11 = pnand %p869_p9, %p1430_p1  ;;  %p938_p12 = scmp.ne.s32.totalorder %s1426_s1, %s937_s6 }
  0x15   : > { %p944_p5 = scmp.lt.u32.totalorder %s937_s6, %s1426_s1 }
  0x16   : > { %p939_p13 = pneg %p1187_p11 }
  0x18   : > { %p940_p0 = pnand %p939_p13, %p938_p12 }
  0x1a   : > { %p941_p3 = pneg %p940_p0 }
  0x1c   : > { %p946_p7 = pnand %p944_p5, %p941_p3 }
  0x1e   : > { %949 = shalt.err (!%p946_p7)
}
  0x1f   : > { %s950_s11 = scalar_lea.vmem %s1180_s25, 1024  ;;  %p958_p2 = scmp.lt.s32.totalorder %s1180_s25, %s1180_s25 }
  0x20   : > { %p951_p9 = scmp.ne.s32.totalorder %s1180_s25, %s950_s11  ;;  %p959_p6 = scmp.lt.s32.totalorder %s950_s11, %s950_s11 }
  0x22   : > { %p953_p10 = pnand %p951_p9, %p939_p13  ;;  %p960_p4 = por %p959_p6, %p958_p2 }
  0x24   : > { %p954_p1 = pneg %p953_p10 }
  0x26   : > { %p961_p8 = pnand %p960_p4, %p954_p1 }
  0x28   : > { %964 = shalt.err (!%p961_p8)
}
  0x29   : > { %s1100_s12 = smov 64   ;;  %s1101_s13 = smov 4  }
  0x2a   : > { %872 = dma.hbm_to_vmem [thread:$0]  (!%p1187_p11), %s1426_s1, 1024, %s1180_s25, [#allocation6], %s1100_s12, %s1100_s12, %s1101_s13  }
  0x2b   : > { %p30_p2 = scmp.eq.s32.totalorder %s29_s29, 0  ;;  %p39_p1 = scmp.ne.s32.totalorder %s1093_s17, %s1089_s16 }
  0x2c   : > { %p40_p4 = scmp.eq.s32.totalorder %s1097_s18, 0  ;;  %p885_p6 = scmp.lt.s32.totalorder %s1097_s18, 2 }
  0x2d   : > { %s1223_s24 = scalar_select %p30_p2, %s1093_s17, %s32_s28  }
  0x2e   : > { %p41_p8 = por %p40_p4, %p39_p1  ;;  %p1437_p10 = scmp.eq.s32.totalorder %s1157_s19, 1 }
  0x2f   : > { %s179_s5 = sand.u32 1, %s1093_s17   ;;  %s729_s6 = sshll.u32 %s1097_s18, 11 }
  0x30   : > { %p1227_p12 = por %p1437_p10, %p39_p1  ;;  %s688_s7 = sshll.u32 %s179_s5, 7 }
  0x31   : > { %s1236_s9 = scalar_lea.hbm %s1425_s0, %s729_s6  ;;  %s183_s25 = scalar_lea.vmem [#allocation2], %s688_s7 }
  0x32   : > { %s190_s28 = sshll.u32 %s183_s25, 4  ;;  %p1238_p11 = pnand %p885_p6, %p41_p8  ;;  %s1242_s28 = int_to_ptr.vmem [resolvable:$true] %s190_s28 }
  0x33   : > { %s1244_s10 = scalar_lea.sflag [#allocation3], %s179_s5  ;;  %s965_s11 = scalar_lea.hbm %s1236_s9, 2048 }
  0x34   : > { %p966_p13 = scmp.ne.s32.totalorder %s1236_s9, %s965_s11  ;;  %p967_p0 = pneg %p1238_p11 }
  0x35   : > { %s970_s14 = scalar_lea.hbm %s1425_s0, 4096  ;;  %p971_p7 = scmp.lt.u32.totalorder %s1236_s9, %s1425_s0 }
  0x36   : > { %p968_p3 = pnand %p967_p0, %p966_p13  ;;  %p972_p9 = scmp.lt.u32.totalorder %s970_s14, %s965_s11 }
  0x37   : > { %p974_p1 = scmp.lt.u32.totalorder %s965_s11, %s1236_s9 }
  0x38   : > { %p969_p5 = pneg %p968_p3  ;;  %p973_p2 = por %p972_p9, %p971_p7 }
  0x3a   : > { %p975_p4 = por %p974_p1, %p973_p2 }
  0x3c   : > { %p976_p6 = pnand %p975_p4, %p969_p5 }
  0x3e   : > { %979 = shalt.err (!%p976_p6)
}
  0x3f   : > { %s980_s5 = scalar_lea.vmem %s1242_s28, 2048  ;;  %s1102_s7 = smov [#allocation2]  }
  0x40   : > { %p981_p8 = scmp.ne.s32.totalorder %s1242_s28, %s980_s5  ;;  %s985_s26 = sshll.u32 %s1102_s7, 4  ;;  %s986_s26 = int_to_ptr.vmem [resolvable:$false] %s985_s26 }
  0x41   : > { %s987_s8 = scalar_lea.vmem %s986_s26, 4096  ;;  %p988_p3 = scmp.lt.s32.totalorder %s1242_s28, %s986_s26 }
  0x42   : > { %p983_p10 = pnand %p981_p8, %p967_p0  ;;  %p989_p7 = scmp.lt.s32.totalorder %s987_s8, %s980_s5 }
  0x44   : > { %p984_p13 = pneg %p983_p10  ;;  %p990_p9 = por %p989_p7, %p988_p3 }
  0x46   : > { %p991_p2 = pnand %p990_p9, %p984_p13 }
  0x48   : > { %994 = shalt.err (!%p991_p2)
}
  0x49   : > { %s1103_s25 = smov 128   ;;  %s1104_s11 = smov 8  }
  0x4a   : > { %876 = dma.hbm_to_vmem [thread:$0]  (!%p1238_p11), %s1236_s9, 2048, %s1242_s28, %s1244_s10, %s1103_s25, %s1103_s25, %s1104_s11  }
  0x4b   : > { %p1440_p0 = scmp.ne.s32.totalorder %s1435_s23, 0 }
  0x4c   : > { %s1275_s12 = sand.u32 (!%p1440_p0), 1, %s1089_s16   ;;  %p1441_p5 = scmp.ne.s32.totalorder (!%p1440_p0), %s1433_s21, 0 }
  0x4d   : > { %202 = sbr.rel (%p1440_p0) target bundleno = 386 (0x182), region = 32  ;;  %s692_s13 = sshll.u32 (!%p1440_p0), %s1275_s12, 7 }
  0x4e   : > { %s205_s14 = scalar_lea.sflag (!%p1440_p0), [#allocation3], %s1275_s12  ;;  %s1281_s20 = scalar_lea.vmem (!%p1440_p0), [#allocation2], %s692_s13 }
  0x54   : > { %1068 = dma.done.wait (%p1441_p5), %s205_s14, 2048  }
  0x55   : > { %1070 = vsyncadd (%p1441_p5), %s205_s14, 4294965248  ;;  %p1442_p11 = scmp.eq.s32.totalorder %s1157_s19, 0 }
  0x57   : > { %1072 = dma.done.wait (%p1442_p11), [#allocation6], 1024   ;;  %p1443_p1 = pmov %p1442_p11 }
  0x58   : > { %v929_v0 = vld [vmem:[#allocation5] sm:$0xff]   ;;  %v930_v1 = vld [vmem:[#allocation5 + $0x8] sm:$0xff]   ;;  %v931_v2 = vld [vmem:[#allocation5 + $0x10] sm:$0xff]   ;;  %s695_s9 = sshll.u32 %s1275_s12, 6  ;;  %s1313_s28 = scalar_lea.vmem [#allocation7], %s692_s13 }
  0x59   : > { %1074 = vsyncadd (%p1443_p1), [#allocation6], 4294966272  ;;  %811 = vmatprep.subr.bf16.mxu0 %v929_v0  ;;  %843 = vmatprep.subr.bf16.mxu1 %v929_v0  ;;  %v932_v3 = vld [vmem:[#allocation5 + $0x18] sm:$0xff]   ;;  %v246_v4 = vld [vmem:[%s1281_s20] sm:$0xff]  ;;  %s1321_s29 = scalar_lea.vmem [#allocation8], %s695_s9  ;;  %s746_s6 = sshll.u32 %s1157_s19, 11 }
  0x5a   : > { %812 = vmatpush3.bf16.msra.mxu0 %v929_v0  ;;  %851 = vmatpush3.bf16.msra.mxu1 %v929_v0  ;;  %v247_v5 = vld [vmem:[%s1281_s20 + $0x8] sm:$0xff]  ;;  %v254_v6 = vld [vmem:[%s1281_s20 + $0x40] sm:$0xff]  ;;  %v935_v12 = vld [vmem:[#allocation5 + $0x30] sm:$0xff]   ;;  %s569_s10 = sshll.u32 %s1321_s29, 4  ;;  %s553_s5 = sshll.u32 %s1313_s28, 4  ;;  %s1332_s10 = int_to_ptr.vmem [resolvable:$true] %s569_s10  ;;  %s1341_s5 = int_to_ptr.vmem [resolvable:$true] %s553_s5 }
  0x5b   : > { %813 = vmatprep.subr.bf16.mxu0 %v930_v1  ;;  %844 = vmatprep.subr.bf16.mxu1 %v930_v1  ;;  %v262_v7 = vpack.c.bf16 %v247_v5, %v246_v4  ;;  %v255_v8 = vld [vmem:[%s1281_s20 + $0x48] sm:$0xff]  ;;  %v933_v10 = vld [vmem:[#allocation5 + $0x20] sm:$0xff]   ;;  %v936_v13 = vld [vmem:[#allocation5 + $0x38] sm:$0xff]   ;;  %s1337_s8 = scalar_lea.hbm %s1428_s3, %s746_s6  ;;  %s747_s25 = sshll.u32 %s1157_s19, 10 }
  0x5c   : > { %v266_v9 = vpack.c.bf16 %v255_v8, %v254_v6  ;;  %v934_v11 = vld [vmem:[#allocation5 + $0x28] sm:$0xff]   ;;  %v248_v14 = vld [vmem:[%s1281_s20 + $0x10] sm:$0xff]  ;;  %v249_v15 = vld [vmem:[%s1281_s20 + $0x18] sm:$0xff]  ;;  %s1353_s19 = scalar_lea.hbm %s1429_s4, %s747_s25  ;;  %s535_s14 = scalar_lea.sflag [#allocation4], %s1275_s12 }
  0x5d   : > { %827 = vmatprep.mubr.bf16.mxu0 %v262_v7  ;;  %v256_v16 = vld [vmem:[%s1281_s20 + $0x50] sm:$0xff]  ;;  %v257_v17 = vld [vmem:[%s1281_s20 + $0x58] sm:$0xff]  ;;  %v250_v18 = vld [vmem:[%s1281_s20 + $0x20] sm:$0xff]  ;;  %v263_v22 = vpack.c.bf16 %v249_v15, %v248_v14  ;;  %s1105_s21 = smov [#allocation7]  }
  0x5e   : > { %814 = vmatpush3.bf16.msra.mxu0 %v930_v1  ;;  %852 = vmatpush3.bf16.msra.mxu1 %v930_v1  ;;  %v251_v19 = vld [vmem:[%s1281_s20 + $0x28] sm:$0xff]  ;;  %v258_v20 = vld [vmem:[%s1281_s20 + $0x60] sm:$0xff]  ;;  %v267_v23 = vpack.c.bf16 %v257_v17, %v256_v16  ;;  %v252_v26 = vld [vmem:[%s1281_s20 + $0x30] sm:$0xff]  ;;  %s999_s23 = sshll.u32 %s1105_s21, 4  ;;  %s1000_s23 = int_to_ptr.vmem [resolvable:$false] %s999_s23 }
  0x5f   : > { %815 = vmatprep.subr.bf16.mxu0 %v931_v2  ;;  %845 = vmatprep.subr.bf16.mxu1 %v931_v2  ;;  %v259_v21 = vld [vmem:[%s1281_s20 + $0x68] sm:$0xff]  ;;  %v264_v24 = vpack.c.bf16 %v251_v19, %v250_v18  ;;  %v253_v27 = vld [vmem:[%s1281_s20 + $0x38] sm:$0xff]  ;;  %v260_v28 = vld [vmem:[%s1281_s20 + $0x70] sm:$0xff]  ;;  %s1001_s9 = scalar_lea.vmem %s1000_s23, 4096  ;;  %p1002_p10 = scmp.lt.s32.totalorder %s1341_s5, %s1000_s23 }
  0x60   : > { %835 = vmatprep.mubr.bf16.mxu1 %v266_v9  ;;  %v268_v25 = vpack.c.bf16 %v259_v21, %v258_v20  ;;  %v261_v29 = vld [vmem:[%s1281_s20 + $0x78] sm:$0xff]  ;;  %v265_v30 = vpack.c.bf16 %v253_v27, %v252_v26  ;;  %v696_v32 = vld [vmem:[%s1427_s2] ss:$0 sm:$0xff]  ;;  %s995_s20 = scalar_lea.vmem %s1341_s5, 2048 }
  0x61   : > { %v269_v31 = vpack.c.bf16 %v261_v29, %v260_v28  ;;  %p996_p4 = scmp.ne.s32.totalorder %s1341_s5, %s995_s20  ;;  %p1003_p13 = scmp.lt.s32.totalorder %s1001_s9, %s995_s20 }
  0x62   : > { %816 = vmatpush3.bf16.msra.mxu0 %v931_v2  ;;  %853 = vmatpush3.bf16.msra.mxu1 %v931_v2 }
  0x63   : > { %817 = vmatprep.subr.bf16.mxu0 %v932_v3  ;;  %846 = vmatprep.subr.bf16.mxu1 %v932_v3  ;;  %p997_p6 = pnand %p996_p4, %p1227_p12  ;;  %p1004_p3 = por %p1003_p13, %p1002_p10 }
  0x65   : > { %p998_p8 = pneg %p997_p6 }
  0x66   : > { %818 = vmatpush3.bf16.msra.mxu0 %v932_v3  ;;  %854 = vmatpush3.bf16.msra.mxu1 %v932_v3 }
  0x67   : > { %819 = vmatprep.subr.bf16.mxu0 %v933_v10  ;;  %847 = vmatprep.subr.bf16.mxu1 %v933_v10  ;;  %p1005_p7 = pnand %p1004_p3, %p998_p8 }
  0x6a   : > { %820 = vmatpush3.bf16.msra.mxu0 %v933_v10  ;;  %855 = vmatpush3.bf16.msra.mxu1 %v933_v10 }
  0x6b   : > { %821 = vmatprep.subr.bf16.mxu0 %v934_v11  ;;  %848 = vmatprep.subr.bf16.mxu1 %v934_v11 }
  0x6e   : > { %822 = vmatpush3.bf16.msra.mxu0 %v934_v11  ;;  %856 = vmatpush3.bf16.msra.mxu1 %v934_v11 }
  0x6f   : > { %823 = vmatprep.subr.bf16.mxu0 %v935_v12  ;;  %849 = vmatprep.subr.bf16.mxu1 %v935_v12 }
  0x72   : > { %824 = vmatpush3.bf16.msra.mxu0 %v935_v12  ;;  %857 = vmatpush3.bf16.msra.mxu1 %v935_v12 }
  0x73   : > { %825 = vmatprep.subr.bf16.mxu0 %v936_v13  ;;  %850 = vmatprep.subr.bf16.mxu1 %v936_v13 }
  0x76   : > { %826 = vmatpush3.bf16.msra.mxu0 %v936_v13  ;;  %858 = vmatpush3.bf16.msra.mxu1 %v936_v13 }
  0x79   : > { %828 = vmatmul.mubr.bf16.vlgmr.msra.gmra.mrb[0].mxu0 %v263_v22  ;;  %836 = vmatmul.mubr.bf16.vlgmr.msra.gmra.mrb[0].mxu1 %v267_v23 }
  0x7a   : > { %831 = vmatprep.mubr.bf16.mxu0 %v264_v24  ;;  %839 = vmatprep.mubr.bf16.mxu1 %v268_v25 }
  0x81   : > { %832 = vmatmul.mubr.bf16.gmra.mrb[4].mxu0 %v265_v30  ;;  %840 = vmatmul.mubr.bf16.gmra.mrb[4].mxu1 %v269_v31 }
 0x14c   : > { %v829_v33 = vpop.f32.mrb[0].mxu0  ;;  %v837_v34 = vpop.f32.mrb[0].mxu1 }
 0x14d   : > { %v384_v35 = vadd.f32 %v829_v33, %v696_v32  ;;  %v416_v36 = vadd.f32 %v837_v34, %v696_v32  ;;  %v375_v37 = vpop.f32.mrb[1].mxu0  ;;  %v407_v38 = vpop.f32.mrb[1].mxu1 }
 0x14e   : > { %v376_v39 = vadd.f32 %v696_v32, %v375_v37  ;;  %v408_v40 = vadd.f32 %v696_v32, %v407_v38  ;;  %v830_v41 = vpop.f32.mrb[2].mxu0  ;;  %v838_v42 = vpop.f32.mrb[2].mxu1 }
 0x14f   : > { %440 = vst [vmem:[%s1313_s28 + $0x10] sm:$0xff] %v384_v35  ;;  %448 = vst [vmem:[%s1313_s28 + $0x50] sm:$0xff] %v416_v36  ;;  %v387_v43 = vadd.f32 %v830_v41, %v696_v32  ;;  %v419_v44 = vadd.f32 %v838_v42, %v696_v32  ;;  %v378_v45 = vpop.f32.mrb[3].mxu0  ;;  %v410_v46 = vpop.f32.mrb[3].mxu1 }
 0x150   : > { %438 = vst [vmem:[%s1313_s28] sm:$0xff] %v376_v39  ;;  %446 = vst [vmem:[%s1313_s28 + $0x40] sm:$0xff] %v408_v40  ;;  %v379_v47 = vadd.f32 %v696_v32, %v378_v45  ;;  %v411_v48 = vadd.f32 %v696_v32, %v410_v46 }
 0x151   : > { %441 = vst [vmem:[%s1313_s28 + $0x18] sm:$0xff] %v387_v43  ;;  %v756_v49 = vpack.c.bf16 %v387_v43, %v384_v35  ;;  %449 = vst [vmem:[%s1313_s28 + $0x58] sm:$0xff] %v419_v44  ;;  %v776_v50 = vpack.c.bf16 %v419_v44, %v416_v36 }
 0x152   : > { %439 = vst [vmem:[%s1313_s28 + $0x8] sm:$0xff] %v379_v47  ;;  %v751_v51 = vpack.c.bf16 %v379_v47, %v376_v39  ;;  %447 = vst [vmem:[%s1313_s28 + $0x48] sm:$0xff] %v411_v48  ;;  %v771_v52 = vpack.c.bf16 %v411_v48, %v408_v40 }
 0x153   : > { %788 = vst [vmem:[%s1321_s29 + $0x8] sm:$0xff] %v756_v49   ;;  %792 = vst [vmem:[%s1321_s29 + $0x28] sm:$0xff] %v776_v50  }
 0x154   : > { %752 = vst [vmem:[%s1321_s29] sm:$0xff] %v751_v51   ;;  %791 = vst [vmem:[%s1321_s29 + $0x20] sm:$0xff] %v771_v52   ;;  %v833_v53 = vpop.f32.mrb[4].mxu0  ;;  %v841_v54 = vpop.f32.mrb[4].mxu1 }
 0x155   : > { %v400_v55 = vadd.f32 %v833_v53, %v696_v32  ;;  %v432_v56 = vadd.f32 %v841_v54, %v696_v32  ;;  %v391_v57 = vpop.f32.mrb[5].mxu0  ;;  %v423_v58 = vpop.f32.mrb[5].mxu1 }
 0x156   : > { %v392_v59 = vadd.f32 %v696_v32, %v391_v57  ;;  %v424_v60 = vadd.f32 %v696_v32, %v423_v58  ;;  %v834_v61 = vpop.f32.mrb[6].mxu0  ;;  %v842_v62 = vpop.f32.mrb[6].mxu1 }
 0x157   : > { %444 = vst [vmem:[%s1313_s28 + $0x30] sm:$0xff] %v400_v55  ;;  %452 = vst [vmem:[%s1313_s28 + $0x70] sm:$0xff] %v432_v56  ;;  %v403_v63 = vadd.f32 %v834_v61, %v696_v32  ;;  %v435_v0 = vadd.f32 %v842_v62, %v696_v32  ;;  %v394_v1 = vpop.f32.mrb[7].mxu0  ;;  %v426_v2 = vpop.f32.mrb[7].mxu1 }
 0x158   : > { %442 = vst [vmem:[%s1313_s28 + $0x20] sm:$0xff] %v392_v59  ;;  %450 = vst [vmem:[%s1313_s28 + $0x60] sm:$0xff] %v424_v60  ;;  %v395_v3 = vadd.f32 %v696_v32, %v394_v1  ;;  %v427_v4 = vadd.f32 %v696_v32, %v426_v2 }
 0x159   : > { %445 = vst [vmem:[%s1313_s28 + $0x38] sm:$0xff] %v403_v63  ;;  %v766_v5 = vpack.c.bf16 %v403_v63, %v400_v55  ;;  %453 = vst [vmem:[%s1313_s28 + $0x78] sm:$0xff] %v435_v0  ;;  %v786_v6 = vpack.c.bf16 %v435_v0, %v432_v56 }
 0x15a   : > { %443 = vst [vmem:[%s1313_s28 + $0x28] sm:$0xff] %v395_v3  ;;  %v761_v7 = vpack.c.bf16 %v395_v3, %v392_v59  ;;  %451 = vst [vmem:[%s1313_s28 + $0x68] sm:$0xff] %v427_v4  ;;  %v781_v8 = vpack.c.bf16 %v427_v4, %v424_v60 }
 0x15b   : > { %790 = vst [vmem:[%s1321_s29 + $0x18] sm:$0xff] %v766_v5   ;;  %794 = vst [vmem:[%s1321_s29 + $0x38] sm:$0xff] %v786_v6  }
 0x15c   : > { %1008 = shalt.err (!%p1005_p7)
}
 0x15d   : > { %s1009_s28 = scalar_lea.hbm %s1337_s8, 2048  ;;  %s1013_s26 = scalar_lea.hbm %s1428_s3, 4096 }
 0x15e   : > { %p1010_p9 = scmp.ne.s32.totalorder %s1337_s8, %s1009_s28  ;;  %p1014_p5 = scmp.lt.u32.totalorder %s1337_s8, %s1428_s3 }
 0x15f   : > { %p1015_p11 = scmp.lt.u32.totalorder %s1013_s26, %s1009_s28  ;;  %p1017_p4 = scmp.lt.u32.totalorder %s1009_s28, %s1337_s8 }
 0x160   : > { %p1011_p2 = pnand %p1010_p9, %p1227_p12 }
 0x161   : > { %p1016_p1 = por %p1015_p11, %p1014_p5 }
 0x162   : > { %p1012_p0 = pneg %p1011_p2 }
 0x163   : > { %p1018_p6 = por %p1017_p4, %p1016_p1 }
 0x165   : > { %p1019_p8 = pnand %p1018_p6, %p1012_p0 }
 0x167   : > { %1022 = shalt.err (!%p1019_p8)
}
 0x168   : > { %s1106_s13 = smov 128   ;;  %s1107_s20 = smov 8   ;;  %789 = vst [vmem:[%s1321_s29 + $0x10] sm:$0xff] %v761_v7   ;;  %793 = vst [vmem:[%s1321_s29 + $0x30] sm:$0xff] %v781_v8  }
 0x169   : > { %865 = dma.vmem_to_hbm [thread:$0]  (%p1227_p12), %s1341_s5, 2048, %s1337_s8, %s535_s14, %s1106_s13, %s1106_s13, %s1107_s20  }
 0x16a   : > { %s540_s21 = scalar_lea.sflag [#allocation9], %s1275_s12  ;;  %s1023_s23 = scalar_lea.vmem %s1332_s10, 1024 }
 0x16b   : > { %p1024_p10 = scmp.ne.s32.totalorder %s1332_s10, %s1023_s23  ;;  %s1108_s9 = smov [#allocation8]  }
 0x16c   : > { %s1027_s28 = sshll.u32 %s1108_s9, 4  ;;  %s1028_s28 = int_to_ptr.vmem [resolvable:$false] %s1027_s28 }
 0x16d   : > { %p1025_p13 = pnand %p1024_p10, %p1227_p12  ;;  %s1029_s6 = scalar_lea.vmem %s1028_s28, 2048 }
 0x16e   : > { %p1030_p7 = scmp.lt.s32.totalorder %s1332_s10, %s1028_s28  ;;  %p1031_p9 = scmp.lt.s32.totalorder %s1029_s6, %s1023_s23 }
 0x16f   : > { %p1026_p3 = pneg %p1025_p13 }
 0x170   : > { %p1032_p2 = por %p1031_p9, %p1030_p7 }
 0x172   : > { %p1033_p0 = pnand %p1032_p2, %p1026_p3 }
 0x174   : > { %1036 = shalt.err (!%p1033_p0)
}
 0x175   : > { %s1037_s29 = scalar_lea.hbm %s1353_s19, 1024  ;;  %s1041_s14 = scalar_lea.hbm %s1429_s4, 2048 }
 0x176   : > { %p1038_p5 = scmp.ne.s32.totalorder %s1353_s19, %s1037_s29  ;;  %p1042_p4 = scmp.lt.u32.totalorder %s1353_s19, %s1429_s4 }
 0x177   : > { %p1043_p6 = scmp.lt.u32.totalorder %s1041_s14, %s1037_s29  ;;  %p1045_p10 = scmp.lt.u32.totalorder %s1037_s29, %s1353_s19 }
 0x178   : > { %p1039_p11 = pnand %p1038_p5, %p1227_p12 }
 0x179   : > { %p1044_p8 = por %p1043_p6, %p1042_p4 }
 0x17a   : > { %p1040_p1 = pneg %p1039_p11 }
 0x17b   : > { %p1046_p13 = por %p1045_p10, %p1044_p8 }
 0x17d   : > { %p1047_p3 = pnand %p1046_p13, %p1040_p1 }
 0x17f   : > { %1050 = shalt.err (!%p1047_p3)
}
 0x180   : > { %s1109_s25 = smov 64   ;;  %s1110_s11 = smov 4  }
 0x181   : > { %866 = dma.vmem_to_hbm [thread:$0]  (%p1227_p12), %s1332_s10, 1024, %s1353_s19, %s540_s21, %s1109_s25, %s1109_s25, %s1110_s11  }
 0x182 PF: > { %s584_s13 = sand.u32 1, %s1085_s15   ;;  %p1444_p7 = scmp.ne.s32.totalorder %s1434_s22, 0 }
 0x183   : > { %p1445_p9 = scmp.ge.s32.totalorder %s1097_s18, 2  ;;  %s585_s20 = scalar_lea.sflag [#allocation4], %s584_s13 }
 0x185   : > { %p878_p2 = pnand %p1445_p9, %p1444_p7 }
 0x187   : > { %1076 = dma.done.wait (!%p878_p2), %s585_s20, 2048  }
 0x188   : > { %1078 = vsyncadd (!%p878_p2), %s585_s20, 4294965248  ;;  %s594_s23 = scalar_lea.sflag [#allocation9], %s584_s13 }
 0x189   : > { %1080 = dma.done.wait (!%p878_p2), %s594_s23, 1024  }
 0x18a   : > { %1082 = vsyncadd (!%p878_p2), %s594_s23, 4294966272  ;;  %p22_p12 = scmp.ge.s32.totalorder %s1192_s27, 4   ;;  %s1446_s15 = smov %s1089_s16 }
 0x18b   : > { %s1447_s16 = smov %s1093_s17  ;;  %s1448_s17 = smov %s1223_s24 }
 0x18c   : > { %s1449_s18 = smov %s1192_s27  ;;  %24 = sbr.rel (!%p22_p12) target bundleno = 8 (0x8), region = 98 }
 0x193   :  { %599 = vsyncpa [#allocation3], 1 }
 0x194   :  { %601 = vsyncpa [#allocation3 + $0x1], 1 }
 0x195   :  { %602 = vsyncpa [#allocation6], 1 }
 0x196   :  { %603 = vsyncpa [#allocation4], 1 }
 0x197   :  { %605 = vsyncpa [#allocation4 + $0x1], 1 }
 0x198   :  { %606 = vsyncpa [#allocation9], 1 }
 0x199   :  { %608 = vsyncpa [#allocation9 + $0x1], 1 }

</bundles_post_ra>
